<compile_context>
chip_gen: v7x
topology: tpu7x:2x2x1
jax: 0.10.0
libtpu: 0.0.40
codegen_flags: <defaults>
</compile_context>

<pallas_src>
import numpy as np

import jax
import jax.numpy as jnp
from jax.experimental import pallas as pl
from jax.experimental.pallas import tpu as pltpu


def _moving_avg_kernel(w_ref, x_ref, o_ref):
    """One grid step: (Bt, L, C) input block -> (Bt, out_len, C) output block.

    w_ref is the VMEM-resident (out_len, L) banded averaging matrix.  The
    replicate padding, window sum and stride are all encoded in W, so the body
    is a single MXU matmul per batch row -- no edge cases, no concatenates,
    no unaligned sublane slicing.
    """
    bt = x_ref.shape[0]
    w = w_ref[...]                                   # (out_len, L) f32, resident
    for i in range(bt):                              # Bt is small (<= 16): one dot per iter
        xb = x_ref[i].astype(jnp.float32)            # single f32 convert per row
        yb = jnp.dot(w, xb, preferred_element_type=jnp.float32)
        o_ref[i] = yb.astype(o_ref.dtype)


def _build_avg_matrix(L, kernel_size, stride):
    """(out_len, L) f32 matrix realizing replicate-padded AvgPool1d."""
    front_rep = kernel_size - 1 - (kernel_size - 1) // 2   # matches the torch code
    out_len = (L - 1) // stride + 1
    o_idx = np.arange(out_len)[:, None] * stride           # (out_len, 1)
    k_idx = np.arange(kernel_size)[None, :]                 # (1, k)
    t = np.clip(o_idx + k_idx - front_rep, 0, L - 1)        # (out_len, k) tap targets
    counts = np.zeros((out_len, L), np.float32)
    rows = np.broadcast_to(np.arange(out_len)[:, None], t.shape)
    np.add.at(counts, (rows, t), 1.0)
    return counts * np.float32(1.0 / kernel_size), out_len


def moving_avg(x, kernel_size, stride):
    """Pallas implementation of the `moving_avg` module forward pass.

    Args:
      x: (B, L, C) array.
      kernel_size, stride: AvgPool1d parameters.
    Returns:
      (B, out_len, C) array, out_len = (L - 1)//stride + 1.
    """
    B, L, C = x.shape
    itemsize = x.dtype.itemsize

    W_np, out_len = _build_avg_matrix(L, kernel_size, stride)
    W = jnp.asarray(W_np)
    w_bytes = out_len * L * 4

    # Real device VMEM budget (v7x: 64 MiB/TC; v5e/v6e: 128 MiB) with headroom.
    try:
        info = pltpu.get_tpu_info()
        vmem_cap = int(getattr(info, "vmem_capacity_bytes", 64 << 20))
    except Exception:
        vmem_cap = 64 << 20
    budget = min(vmem_cap - (16 << 20), 100 << 20)
    budget = max(budget, 16 << 20)

    def est_vmem(bt):
        in_blk = bt * L * C * itemsize
        out_blk = bt * out_len * C * itemsize
        # double-buffered in/out blocks + W (2 buffers) + one row of f32
        # intermediates + slack for compiler-internal scratch.
        return 2 * (in_blk + out_blk) + 2 * w_bytes + (L + out_len) * C * 4 + (2 << 20)

    # Batch rows per grid step: ~8 MiB input blocks to amortize per-step
    # overhead, capped so the grid has >= 2 steps when B >= 2 (v7x megacore),
    # capped at 16 (static unroll of the per-row dot loop), shrunk to fit VMEM.
    target_block_bytes = 8 << 20
    bt_cap = max(1, target_block_bytes // max(1, L * C * itemsize))
    Bt = int(min(B, bt_cap, 16))
    if B >= 2:
        Bt = min(Bt, -(-B // 2))
    while Bt > 1 and est_vmem(Bt) > budget:
        Bt -= 1
    Bt = max(Bt, 1)

    vmem_limit = int(min(max(est_vmem(Bt), 16 << 20), budget))

    grid = (pl.cdiv(B, Bt),)   # ragged last block allowed (masked by Pallas)

    return pl.pallas_call(
        _moving_avg_kernel,
        out_shape=jax.ShapeDtypeStruct((B, out_len, C), x.dtype),
        grid_spec=pltpu.PrefetchScalarGridSpec(
            num_scalar_prefetch=0,
            grid=grid,
            in_specs=[
                # W: same block every step -> fetched once, VMEM-resident.
                pl.BlockSpec((out_len, L), lambda b: (0, 0)),
                pl.BlockSpec((Bt, L, C), lambda b: (b, 0, 0)),
            ],
            out_specs=pl.BlockSpec((Bt, out_len, C), lambda b: (b, 0, 0)),
        ),
        compiler_params=pltpu.CompilerParams(
            dimension_semantics=("parallel",),
            vmem_limit_bytes=vmem_limit,
        ),
    )(W, x)


def moving_avg_ref(x, kernel_size, stride):
    """Pure-JAX reference mirroring the PyTorch forward exactly."""
    front_rep = kernel_size - 1 - (kernel_size - 1) // 2
    end_rep = (kernel_size - 1) // 2
    front = jnp.repeat(x[:, 0:1, :], front_rep, axis=1)
    end = jnp.repeat(x[:, -1:, :], end_rep, axis=1)
    xp = jnp.concatenate([front, x, end], axis=1)
    L_pad = xp.shape[1]
    out_len = (L_pad - kernel_size) // stride + 1
    taps = [xp[:, k:k + (out_len - 1) * stride + 1:stride, :] for k in range(kernel_size)]
    return sum(t.astype(jnp.float32) for t in taps) / kernel_size


if __name__ == "__main__":
    key = jax.random.PRNGKey(0)

    configs = [
        # (B, L, C, kernel_size, stride)
        (2, 16, 32, 5, 1),   # odd kernel (symmetric replicate pad)
        (2, 16, 32, 4, 1),   # even kernel (asymmetric, front-heavy pad)
        (3, 25, 16, 7, 1),   # odd lengths / channels, ragged batch grid
        (2, 32, 8, 6, 2),    # stride > 1
    ]
    for i, (B, L, C, ksz, st) in enumerate(configs):
        x = jax.random.normal(jax.random.fold_in(key, i), (B, L, C), dtype=jnp.float32)
        out = jax.block_until_ready(moving_avg(x, ksz, st))
        ref = moving_avg_ref(x, ksz, st).astype(out.dtype)
        assert out.shape == ref.shape, (out.shape, ref.shape)
        assert jnp.allclose(out, ref, atol=1e-5, rtol=1e-5), f"mismatch vs reference (config {i})"

    print("KERNEL_OK")
</pallas_src>

<mosaic_0001>
module attributes {stable_mosaic.version = 11 : i64} {
  func.func @_moving_avg_kernel(%arg0: i32, %arg1: memref<16x16xf32, #tpu.memory_space<vmem>>, %arg2: memref<1x16x32xf32, #tpu.memory_space<vmem>>, %arg3: memref<1x16x32xf32, #tpu.memory_space<vmem>>) attributes {dimension_semantics = [#tpu.dimension_semantics<parallel>], iteration_bounds = array<i64: 2>, scalar_prefetch = 0 : i64, scratch_operands = 0 : i64, tpu.core_type = #tpu.core_type<tc>, window_params = [{pipeline_mode = #tpu.pipeline_mode<synchronous>, transform_indices = @transform_0, window_bounds = array<i64: 16, 16>}, {transform_indices = @transform_1, window_bounds = array<i64: 1, 16, 32>}, {transform_indices = @transform_2, window_bounds = array<i64: 1, 16, 32>}]} {
    %c0 = arith.constant 0 : index
    %c0_0 = arith.constant 0 : index
    %0 = vector.load %arg1[%c0, %c0_0] : memref<16x16xf32, #tpu.memory_space<vmem>>, vector<16x16xf32>
    %c0_1 = arith.constant 0 : index
    %c0_2 = arith.constant 0 : index
    %c0_3 = arith.constant 0 : index
    %1 = vector.load %arg2[%c0_1, %c0_2, %c0_3] : memref<1x16x32xf32, #tpu.memory_space<vmem>>, vector<1x16x32xf32>
    %2 = vector.shape_cast %1 : vector<1x16x32xf32> to vector<16x32xf32>
    %cst = arith.constant dense<0.000000e+00> : vector<16x32xf32>
    %3 = tpu.matmul %0, %2, %cst {dimension_numbers = #tpu.dot_dimension_numbers<[1], [0], [0], [1], [0, 0, 1, 1], [], []>} : vector<16x16xf32>, vector<16x32xf32>, vector<16x32xf32> -> vector<16x32xf32>
    %c0_4 = arith.constant 0 : index
    %c0_5 = arith.constant 0 : index
    %c0_6 = arith.constant 0 : index
    %4 = vector.load %arg3[%c0_4, %c0_5, %c0_6] : memref<1x16x32xf32, #tpu.memory_space<vmem>>, vector<1x16x32xf32>
    %5 = vector.shape_cast %4 : vector<1x16x32xf32> to vector<16x32xf32>
    %6 = vector.shape_cast %3 : vector<16x32xf32> to vector<1x16x32xf32>
    tpu.vector_store %arg3[%c0_4, %c0_5, %c0_6], %6 {strides = array<i32>} : memref<1x16x32xf32, #tpu.memory_space<vmem>>, vector<1x16x32xf32>,
    return
  }
  func.func @transform_0(%arg0: i32) -> (i32, i32) {
    %c0_i32 = arith.constant 0 : i32
    %c0_i32_0 = arith.constant 0 : i32
    %c0_i32_1 = arith.constant 0 : i32
    return %c0_i32, %c0_i32_0 : i32, i32
  }
  func.func @transform_1(%arg0: i32) -> (i32, i32, i32) {
    %c0_i32 = arith.constant 0 : i32
    %c0_i32_0 = arith.constant 0 : i32
    %c0_i32_1 = arith.constant 0 : i32
    return %arg0, %c0_i32, %c0_i32_0 : i32, i32, i32
  }
  func.func @transform_2(%arg0: i32) -> (i32, i32, i32) {
    %c0_i32 = arith.constant 0 : i32
    %c0_i32_0 = arith.constant 0 : i32
    %c0_i32_1 = arith.constant 0 : i32
    return %arg0, %c0_i32, %c0_i32_0 : i32, i32, i32
  }
}

</mosaic_0001>

<bundles_post_ra>
// kernel: tpu_custom_call.1
= control target key start
LH: loop header
LB: loop body
LE: loop exit
PB: predicated region body
PF: predicated region fallthrough
CT: control target
= control target key end

     0   :  { %7 = vsyncpa [#allocation3], 0  ;;  %s820_s0 = inlined_call_operand.hbm [shape: f32[16,16], index: 0, kind: input, shape index: {}]   ;;  %s821_s1 = inlined_call_operand.hbm [shape: f32[2,16,32], index: 1, kind: input, shape index: {}]   ;;  %s822_s2 = inlined_call_operand.hbm [shape: f32[2,16,32], index: 2, kind: output, shape index: {}]  }
   0x1   :  { %8 = vsyncpa [#allocation6], 0 }
   0x2   :  { %10 = vsyncpa [#allocation6 + $0x1], 0 }
   0x3   :  { %11 = vsyncpa [#allocation4], 0 }
   0x4   :  { %13 = vsyncpa [#allocation4 + $0x1], 0  ;;  %s613_s9 = smov 0   ;;  %s615_s10 = smov 0  }
   0x5   :  { %s617_s11 = smov 0   ;;  %s619_s12 = smov 0  }
   0x6 LB: > { %s634_s13 = sadd.s32 4294967295, %s589_s12   ;;  %s365_s14 = sadd.s32 4294967294, %s589_s12   ;;  %s589_s12 = sphi %s619_s12, %s842_s12   ;;  %s585_s11 = sphi %s617_s11, %s841_s11   ;;  %s581_s10 = sphi %s615_s10, %s840_s10   ;;  %s577_s9 = sphi %s613_s9, %s839_s9  }
   0x7   : > { %p60_p0 = scmp.ne.s32.totalorder %s581_s10, %s577_s9  ;;  %p823_p1 = scmp.eq.s32.totalorder %s634_s13, 0 }
   0x8   : > { %p90_p3 = scmp.eq.s32.totalorder %s365_s14, 1  ;;  %p366_p5 = scmp.ge.s32.totalorder %s589_s12, 1 }
   0x9   : > { %p643_p4 = por %p823_p1, %p60_p0  ;;  %p97_p7 = scmp.lt.s32.totalorder %s589_s12, 3 }
   0xa   : > { %p648_p6 = por %p90_p3, %p60_p0  ;;  %s591_s18 = smov [#allocation2]  }
   0xb   : > { %s826_s15 = scalar_select %p643_p4, 1, 0 }
   0xc   : > { %s827_s16 = scalar_select %p648_p6, 1, 0 }
   0xd   : > { %p653_p8 = pnand %p366_p5, %p97_p7  ;;  %s109_s19 = sshll.u32 %s591_s18, 4  ;;  %s657_s19 = int_to_ptr.vmem [resolvable:$true] %s109_s19 }
   0xe   : > { %s669_s21 = sadd.s32 1, %s589_s12   ;;  %s47_s22 = sadd.s32 1, %s585_s11 }
   0xf   : > { %s828_s17 = scalar_select %p653_p8, 1, 0 }
  0x10   : > { %p408_p9 = pneg %p653_p8  ;;  %s44_s23 = ssub.s32 %s589_s12, %s669_s21 }
  0x11   : > { %s461_s26 = scalar_lea.hbm %s820_s0, 256 }
  0x12   : > { %p664_p11 = pnand %p408_p9, %p823_p1  ;;  %p462_p12 = scmp.ne.s32.totalorder %s820_s0, %s461_s26 }
  0x13   : > { %p468_p5 = scmp.lt.u32.totalorder %s461_s26, %s820_s0 }
  0x14   : > { %p463_p13 = pneg %p664_p11 }
  0x16   : > { %p464_p0 = pnand %p463_p13, %p462_p12 }
  0x18   : > { %p465_p3 = pneg %p464_p0 }
  0x1a   : > { %p470_p7 = pnand %p468_p5, %p465_p3 }
  0x1c   : > { %473 = shalt.err (!%p470_p7)
}
  0x1d   : > { %s474_s3 = scalar_lea.vmem %s657_s19, 256  ;;  %p482_p2 = scmp.lt.s32.totalorder %s657_s19, %s657_s19 }
  0x1e   : > { %p475_p9 = scmp.ne.s32.totalorder %s657_s19, %s474_s3  ;;  %p483_p6 = scmp.lt.s32.totalorder %s474_s3, %s474_s3 }
  0x20   : > { %p477_p10 = pnand %p475_p9, %p463_p13  ;;  %p484_p4 = por %p483_p6, %p482_p2 }
  0x22   : > { %p478_p1 = pneg %p477_p10 }
  0x24   : > { %p485_p8 = pnand %p484_p4, %p478_p1 }
  0x26   : > { %488 = shalt.err (!%p485_p8)
}
  0x27   : > { %s592_s4 = smov 128   ;;  %s593_s5 = smov 8  }
  0x28   : > { %411 = dma.hbm_to_vmem [thread:$0]  (!%p664_p11), %s820_s0, 256, %s657_s19, [#allocation3], %s592_s4, %s592_s4, %s593_s5  }
  0x29   : > { %p45_p1 = scmp.eq.s32.totalorder %s44_s23, 0  ;;  %p54_p2 = scmp.ne.s32.totalorder %s585_s11, %s581_s10 }
  0x2a   : > { %p55_p4 = scmp.eq.s32.totalorder %s589_s12, 0  ;;  %p421_p6 = scmp.lt.s32.totalorder %s589_s12, 2 }
  0x2b   : > { %s703_s8 = scalar_select %p45_p1, %s585_s11, %s47_s22  }
  0x2c   : > { %p56_p8 = por %p55_p4, %p54_p2  ;;  %p830_p10 = scmp.eq.s32.totalorder %s634_s13, 1 }
  0x2d   : > { %s123_s18 = sand.u32 1, %s585_s11   ;;  %s383_s20 = sshll.u32 %s589_s12, 8 }
  0x2e   : > { %p707_p12 = por %p830_p10, %p54_p2  ;;  %s369_s24 = sshll.u32 %s123_s18, 4 }
  0x2f   : > { %s716_s27 = scalar_lea.hbm %s821_s1, %s383_s20  ;;  %s127_s19 = scalar_lea.vmem [#allocation5], %s369_s24 }
  0x30   : > { %s134_s22 = sshll.u32 %s127_s19, 4  ;;  %p718_p11 = pnand %p421_p6, %p56_p8  ;;  %s722_s22 = int_to_ptr.vmem [resolvable:$true] %s134_s22 }
  0x31   : > { %s724_s28 = scalar_lea.sflag [#allocation6], %s123_s18  ;;  %s489_s29 = scalar_lea.hbm %s716_s27, 256 }
  0x32   : > { %p490_p13 = scmp.ne.s32.totalorder %s716_s27, %s489_s29  ;;  %p491_p0 = pneg %p718_p11 }
  0x33   : > { %s494_s6 = scalar_lea.hbm %s821_s1, 512  ;;  %p495_p7 = scmp.lt.u32.totalorder %s716_s27, %s821_s1 }
  0x34   : > { %p492_p3 = pnand %p491_p0, %p490_p13  ;;  %p496_p9 = scmp.lt.u32.totalorder %s494_s6, %s489_s29 }
  0x35   : > { %p498_p2 = scmp.lt.u32.totalorder %s489_s29, %s716_s27 }
  0x36   : > { %p493_p5 = pneg %p492_p3  ;;  %p497_p1 = por %p496_p9, %p495_p7 }
  0x38   : > { %p499_p4 = por %p498_p2, %p497_p1 }
  0x3a   : > { %p500_p6 = pnand %p499_p4, %p493_p5 }
  0x3c   : > { %503 = shalt.err (!%p500_p6)
}
  0x3d   : > { %s504_s18 = scalar_lea.vmem %s722_s22, 256  ;;  %s594_s24 = smov [#allocation5]  }
  0x3e   : > { %p505_p8 = scmp.ne.s32.totalorder %s722_s22, %s504_s18  ;;  %s509_s25 = sshll.u32 %s594_s24, 4  ;;  %s510_s25 = int_to_ptr.vmem [resolvable:$false] %s509_s25 }
  0x3f   : > { %s511_s26 = scalar_lea.vmem %s510_s25, 512  ;;  %p512_p3 = scmp.lt.s32.totalorder %s722_s22, %s510_s25 }
  0x40   : > { %p507_p10 = pnand %p505_p8, %p491_p0  ;;  %p513_p7 = scmp.lt.s32.totalorder %s511_s26, %s504_s18 }
  0x42   : > { %p508_p13 = pneg %p507_p10  ;;  %p514_p9 = por %p513_p7, %p512_p3 }
  0x44   : > { %p515_p1 = pnand %p514_p9, %p508_p13 }
  0x46   : > { %518 = shalt.err (!%p515_p1)
}
  0x47   : > { %415 = dma.hbm_to_vmem [thread:$0]  (!%p718_p11), %s716_s27, 256, %s722_s22, %s724_s28, %s592_s4, %s592_s4, %s593_s5  }
  0x48   : > { %p833_p0 = scmp.ne.s32.totalorder %s828_s17, 0 }
  0x49   : > { %p834_p5 = scmp.eq.s32.totalorder (!%p833_p0), %s634_s13, 0 }
  0x4a   : > { %146 = sbr.rel (%p833_p0) target bundleno = 321 (0x141), region = 28 }
  0x51   : > { %564 = dma.done.wait (%p834_p5), [#allocation3], 256   ;;  %p835_p2 = pmov %p834_p5 }
  0x52   : > { %s762_s19 = sand.u32 1, %s581_s10   ;;  %p836_p4 = scmp.ne.s32.totalorder %s826_s15, 0 }
  0x53   : > { %566 = vsyncadd (%p835_p2), [#allocation3], 4294967040  ;;  %s374_s23 = sshll.u32 %s762_s19, 4  ;;  %s153_s29 = scalar_lea.sflag [#allocation6], %s762_s19 }
  0x54   : > { %s156_s30 = scalar_lea.vmem [#allocation5], %s374_s23 }
  0x55   : > { %568 = dma.done.wait (%p836_p4), %s153_s29, 256  }
  0x56   : > { %570 = vsyncadd (%p836_p4), %s153_s29, 4294967040  ;;  %vm181_vm0 = vcmask 130048   ;;  %v179_v0 = vld [vmem:[%s156_s30] sm:$0xff]  ;;  %v180_v1 = vld [vmem:[%s156_s30 + $0x8] sm:$0xff]  ;;  %s176_s17 = scalar_lea.vmem [#allocation7], %s374_s23  ;;  %s384_s5 = sshll.u32 %s634_s13, 8 }
  0x57   : > { %v177_v2 = vld [vmem:[#allocation2] sm:$0xff]  ;;  %v396_v3 = vpack.c.bf16 %v180_v1, %v179_v0  ;;  %v178_v4 = vld [vmem:[#allocation2 + $0x8] sm:$0xff]  ;;  %s280_s4 = sshll.u32 %s176_s17, 4  ;;  %vm263_vm1 = vcmask 261120   ;;  %s776_s22 = scalar_lea.hbm %s822_s2, %s384_s5  ;;  %s771_s4 = int_to_ptr.vmem [resolvable:$true] %s280_s4 }
  0x58   : > { %393 = vmatprep.mubr.msk.f32.mxu0 %vm181_vm0, %v177_v2  ;;  %s267_s28 = scalar_lea.sflag [#allocation4], %s762_s19  ;;  %s519_s3 = scalar_lea.vmem %s771_s4, 256 }
  0x59   : > { %397 = vmatprep.subr.bf16.mxu0 %v396_v3  ;;  %p520_p11 = scmp.ne.s32.totalorder %s771_s4, %s519_s3  ;;  %s595_s13 = smov [#allocation7]  }
  0x5a   : > { %399 = vmatpush3.bf16.msra.mxu0 %v396_v3  ;;  %s523_s6 = sshll.u32 %s595_s13, 4  ;;  %s524_s6 = int_to_ptr.vmem [resolvable:$false] %s523_s6 }
  0x5b   : > { %p521_p6 = pnand %p520_p11, %p707_p12  ;;  %s525_s7 = scalar_lea.vmem %s524_s6, 512 }
  0x5c   : > { %p526_p10 = scmp.lt.s32.totalorder %s771_s4, %s524_s6  ;;  %p527_p13 = scmp.lt.s32.totalorder %s525_s7, %s519_s3 }
  0x5d   : > { %394 = vmatmul.mubr.msk.f32.vlgmr.msra.gmra.mrb[0].mxu0 %vm181_vm0, %v178_v4  ;;  %p522_p8 = pneg %p521_p6 }
  0x5e   : > { %p528_p3 = por %p527_p13, %p526_p10 }
  0x60   : > { %p529_p7 = pnand %p528_p3, %p522_p8 }
 0x130   : > { %v395_v5 = vpop.f32.mrb[0].mxu0 }
 0x131   : > { %265 = vst.msk [vmem:[%s176_s17 + $0x8] sm:$0xff] %vm263_vm1, %v395_v5  ;;  %v254_v6 = vpop.f32.mrb[1].mxu0 }
 0x132   : > { %264 = vst.msk [vmem:[%s176_s17] sm:$0xff] %vm263_vm1, %v254_v6 }
 0x133   : > { %532 = shalt.err (!%p529_p7)
}
 0x134   : > { %s533_s20 = scalar_lea.hbm %s776_s22, 256  ;;  %s537_s25 = scalar_lea.hbm %s822_s2, 512 }
 0x135   : > { %p534_p9 = scmp.ne.s32.totalorder %s776_s22, %s533_s20  ;;  %p538_p5 = scmp.lt.u32.totalorder %s776_s22, %s822_s2 }
 0x136   : > { %p539_p2 = scmp.lt.u32.totalorder %s537_s25, %s533_s20  ;;  %p541_p11 = scmp.lt.u32.totalorder %s533_s20, %s776_s22 }
 0x137   : > { %p535_p1 = pnand %p534_p9, %p707_p12 }
 0x138   : > { %p540_p4 = por %p539_p2, %p538_p5 }
 0x139   : > { %p536_p0 = pneg %p535_p1 }
 0x13a   : > { %p542_p6 = por %p541_p11, %p540_p4 }
 0x13c   : > { %p543_p8 = pnand %p542_p6, %p536_p0 }
 0x13e   : > { %546 = shalt.err (!%p543_p8)
}
 0x13f   : > { %s596_s29 = smov 128   ;;  %s597_s30 = smov 8  }
 0x140   : > { %406 = dma.vmem_to_hbm [thread:$0]  (%p707_p12), %s771_s4, 256, %s776_s22, %s267_s28, %s596_s29, %s596_s29, %s597_s30  }
 0x141 PF: > { %s295_s17 = sand.u32 1, %s577_s9   ;;  %p837_p10 = scmp.ne.s32.totalorder %s827_s16, 0 }
 0x142   : > { %p838_p13 = scmp.ge.s32.totalorder %s589_s12, 2  ;;  %s296_s5 = scalar_lea.sflag [#allocation4], %s295_s17 }
 0x144   : > { %p417_p3 = pnand %p838_p13, %p837_p10 }
 0x146   : > { %572 = dma.done.wait (!%p417_p3), %s296_s5, 256  }
 0x147   : > { %574 = vsyncadd (!%p417_p3), %s296_s5, 4294967040  ;;  %p16_p7 = scmp.ge.s32.totalorder %s669_s21, 4   ;;  %s839_s9 = smov %s581_s10 }
 0x148   : > { %s840_s10 = smov %s585_s11  ;;  %s841_s11 = smov %s703_s8 }
 0x149   : > { %s842_s12 = smov %s669_s21  ;;  %18 = sbr.rel (!%p16_p7) target bundleno = 6 (0x6), region = 78 }
 0x150   :  { %301 = vsyncpa [#allocation3], 1 }
 0x151   :  { %303 = vsyncpa [#allocation3 + $0x1], 1 }
 0x152   :  { %304 = vsyncpa [#allocation6], 1 }
 0x153   :  { %306 = vsyncpa [#allocation6 + $0x1], 1 }
 0x154   :  { %307 = vsyncpa [#allocation4], 1 }
 0x155   :  { %309 = vsyncpa [#allocation4 + $0x1], 1 }

</bundles_post_ra>
